<compile_context>
chip_gen: v5e
topology: v5e:2x2
jax: 0.10.0
libtpu: 0.0.40
codegen_flags: <defaults>
</compile_context>

<pallas_src>
import functools
import math

import jax
import jax.numpy as jnp
from jax.experimental import pallas as pl
from jax.experimental.pallas import tpu as pltpu


# ----------------------------------------------------------------------------
# helpers
# ----------------------------------------------------------------------------
def _round_up(x, m):
    return ((x + m - 1) // m) * m


def _pad2d(x, rows, cols):
    r, c = x.shape
    if r == rows and c == cols:
        return x
    return jnp.pad(x, ((0, rows - r), (0, cols - c)))


# ----------------------------------------------------------------------------
# Pallas kernels
# ----------------------------------------------------------------------------
def _linear_kernel(x_ref, w_ref, b_ref, o_ref, acc_ref, *, activation):
    # grid = (M/tm, N/tn, K/tk); K is the reduction axis (last, "arbitrary").
    @pl.when(pl.program_id(2) == 0)
    def _init():
        acc_ref[...] = jnp.zeros_like(acc_ref)

    acc_ref[...] += jnp.dot(x_ref[...], w_ref[...],
                            preferred_element_type=jnp.float32)

    @pl.when(pl.program_id(2) == pl.num_programs(2) - 1)
    def _finalize():
        y = acc_ref[...] + b_ref[...]          # (1, tn) bias broadcasts over rows
        if activation == "relu":
            y = jnp.maximum(y, 0.0)
        o_ref[...] = y.astype(o_ref.dtype)


def _residual_ln_kernel(x_ref, h_ref, g_ref, b_ref, o_ref, *, eps):
    # fused residual add + LayerNorm (post-lnorm): LN(x + h) * g + b
    y = x_ref[...].astype(jnp.float32) + h_ref[...].astype(jnp.float32)
    mu = jnp.mean(y, axis=-1, keepdims=True)
    var = jnp.mean((y - mu) ** 2, axis=-1, keepdims=True)
    o_ref[...] = ((y - mu) * jax.lax.rsqrt(var + eps) * g_ref[...]
                  + b_ref[...]).astype(o_ref.dtype)


def _attention_kernel(q_ref, k_ref, v_ref, bias_ref, ctx_ref, prob_ref, *, scale):
    # block shapes: q (1,H,tq,Dh)  k,v (1,H,Lk,Dh)  bias (1,tq,Lk) additive (-1e9 at masked)
    q = q_ref[0]                                  # (H, tq, Dh) bf16
    k = k_ref[0]                                  # (H, Lk, Dh) bf16
    v = v_ref[0]                                  # (H, Lk, Dh) bf16
    bias = bias_ref[0]                            # (tq, Lk) f32

    s = jnp.einsum("hqd,hkd->hqk", q, k, preferred_element_type=jnp.float32)
    s = s * scale + bias[None, :, :]

    m = jnp.max(s, axis=-1, keepdims=True)
    e = jnp.exp(s - m)
    denom = jnp.sum(e, axis=-1, keepdims=True)
    p = e * pl.reciprocal(denom, approx=True)     # softmax (dropatt=0 / eval)

    ctx_ref[0] = jnp.einsum("hqk,hkd->hqd", p.astype(q.dtype), v,
                            preferred_element_type=jnp.float32)
    prob_ref[0] = p


# ----------------------------------------------------------------------------
# Pallas wrappers
# ----------------------------------------------------------------------------
def linear(x2d, w, b, activation=None, tm_max=256, tn_max=256, tk_max=512):
    M, K = x2d.shape
    N = w.shape[1]
    tm = min(tm_max, _round_up(M, 8))
    tn = min(tn_max, _round_up(N, 128))
    tk = min(tk_max, _round_up(K, 128))
    Mp, Np, Kp = _round_up(M, tm), _round_up(N, tn), _round_up(K, tk)

    xp = _pad2d(x2d, Mp, Kp).astype(jnp.bfloat16)
    wp = _pad2d(w, Kp, Np).astype(jnp.bfloat16)
    bp = _pad2d(b.reshape(1, N).astype(jnp.float32), 1, Np)

    out = pl.pallas_call(
        functools.partial(_linear_kernel, activation=activation),
        grid_spec=pltpu.PrefetchScalarGridSpec(
            num_scalar_prefetch=0,
            grid=(Mp // tm, Np // tn, Kp // tk),
            in_specs=[
                pl.BlockSpec((tm, tk), lambda i, j, k: (i, k)),
                pl.BlockSpec((tk, tn), lambda i, j, k: (k, j)),
                pl.BlockSpec((1, tn), lambda i, j, k: (0, j)),
            ],
            out_specs=pl.BlockSpec((tm, tn), lambda i, j, k: (i, j)),
            scratch_shapes=[pltpu.VMEM((tm, tn), jnp.float32)],
        ),
        out_shape=jax.ShapeDtypeStruct((Mp, Np), jnp.float32),
        compiler_params=pltpu.CompilerParams(
            dimension_semantics=("parallel", "parallel", "arbitrary")),
    )(xp, wp, bp)
    return out[:M, :N]


def residual_layernorm(x2d, h2d, gamma, beta, eps=1e-5):
    M, D = x2d.shape
    tm = min(512, _round_up(M, 8))
    Mp = _round_up(M, tm)
    xp = _pad2d(x2d.astype(jnp.float32), Mp, D)
    hp = _pad2d(h2d.astype(jnp.float32), Mp, D)

    out = pl.pallas_call(
        functools.partial(_residual_ln_kernel, eps=eps),
        grid_spec=pltpu.PrefetchScalarGridSpec(
            num_scalar_prefetch=0,
            grid=(Mp // tm,),
            in_specs=[
                pl.BlockSpec((tm, D), lambda i: (i, 0)),
                pl.BlockSpec((tm, D), lambda i: (i, 0)),
                pl.BlockSpec((1, D), lambda i: (0, 0)),
                pl.BlockSpec((1, D), lambda i: (0, 0)),
            ],
            out_specs=pl.BlockSpec((tm, D), lambda i: (i, 0)),
        ),
        out_shape=jax.ShapeDtypeStruct((Mp, D), jnp.float32),
        compiler_params=pltpu.CompilerParams(dimension_semantics=("parallel",)),
    )(xp, hp, gamma.reshape(1, D).astype(jnp.float32),
      beta.reshape(1, D).astype(jnp.float32))
    return out[:M]


def attention(q, k, v, bias, scale):
    # q, k, v: [B, H, L, Dh];  bias: [B, Lq, Lk] additive (0 keep / -1e9 masked)
    B, H, Lq, Dh = q.shape
    Lk = k.shape[2]
    tq = min(128, _round_up(Lq, 8))
    Lqp = _round_up(Lq, tq)
    if Lqp != Lq:
        q = jnp.pad(q, ((0, 0), (0, 0), (0, Lqp - Lq), (0, 0)))
        bias = jnp.pad(bias, ((0, 0), (0, Lqp - Lq), (0, 0)))

    qb = q.astype(jnp.bfloat16)
    kb = k.astype(jnp.bfloat16)
    vb = v.astype(jnp.bfloat16)

    ctx, prob = pl.pallas_call(
        functools.partial(_attention_kernel, scale=scale),
        grid_spec=pltpu.PrefetchScalarGridSpec(
            num_scalar_prefetch=0,
            grid=(B, Lqp // tq),
            in_specs=[
                pl.BlockSpec((1, H, tq, Dh), lambda b, i: (b, 0, i, 0)),
                pl.BlockSpec((1, H, Lk, Dh), lambda b, i: (b, 0, 0, 0)),
                pl.BlockSpec((1, H, Lk, Dh), lambda b, i: (b, 0, 0, 0)),
                pl.BlockSpec((1, tq, Lk), lambda b, i: (b, i, 0)),
            ],
            out_specs=[
                pl.BlockSpec((1, H, tq, Dh), lambda b, i: (b, 0, i, 0)),
                pl.BlockSpec((1, H, tq, Lk), lambda b, i: (b, 0, i, 0)),
            ],
        ),
        out_shape=[
            jax.ShapeDtypeStruct((B, H, Lqp, Dh), jnp.float32),
            jax.ShapeDtypeStruct((B, H, Lqp, Lk), jnp.float32),
        ],
        compiler_params=pltpu.CompilerParams(
            dimension_semantics=("parallel", "parallel")),
    )(qb, kb, vb, bias.astype(jnp.float32))
    return ctx[:, :, :Lq], prob[:, :, :Lq]


# ----------------------------------------------------------------------------
# Module forward (eval mode)
# ----------------------------------------------------------------------------
def language_wise_attention(p, x, mem, mask, q_lang, kv_lang, n_heads, head_dim):
    B, Lq, D = x.shape
    kv = x if mem is None else jnp.concatenate([mem, x], axis=1)
    Lk = kv.shape[1]
    HD = n_heads * head_dim

    # device-side per-language parameter selection (no host sync)
    qw = jnp.take(p["q_w"], q_lang, axis=0); qb = jnp.take(p["q_b"], q_lang, axis=0)
    kw = jnp.take(p["k_w"], kv_lang, axis=0); kb = jnp.take(p["k_b"], kv_lang, axis=0)
    vw = jnp.take(p["v_w"], kv_lang, axis=0); vb = jnp.take(p["v_b"], kv_lang, axis=0)
    ow = jnp.take(p["o_w"], q_lang, axis=0); ob = jnp.take(p["o_b"], q_lang, axis=0)

    if mem is None:
        # fused QKV projection: x is read from HBM once
        w_qkv = jnp.concatenate([qw, kw, vw], axis=1)          # (D, 3*HD)
        b_qkv = jnp.concatenate([qb, kb, vb], axis=0)          # (3*HD,)
        qkv = linear(x.reshape(B * Lq, D), w_qkv, b_qkv)       # (B*Lq, 3*HD)
        q2 = qkv[:, :HD]
        k2 = qkv[:, HD:2 * HD]
        v2 = qkv[:, 2 * HD:]
    else:
        q2 = linear(x.reshape(B * Lq, D), qw, qb)
        w_kv = jnp.concatenate([kw, vw], axis=1)
        b_kv = jnp.concatenate([kb, vb], axis=0)
        kv2 = linear(kv.reshape(B * Lk, D), w_kv, b_kv)
        k2 = kv2[:, :HD]
        v2 = kv2[:, HD:]

    q = q2.reshape(B, Lq, n_heads, head_dim).transpose(0, 2, 1, 3)
    k = k2.reshape(B, Lk, n_heads, head_dim).transpose(0, 2, 1, 3)
    v = v2.reshape(B, Lk, n_heads, head_dim).transpose(0, 2, 1, 3)

    # additive mask bias (1.0 == masked in the module's mask convention)
    bias = mask.astype(jnp.float32) * (-1e9)

    ctx, prob = attention(q, k, v, bias, 1.0 / math.sqrt(head_dim))

    ctx = ctx.transpose(0, 2, 1, 3).reshape(B * Lq, HD)
    attn_out = linear(ctx, ow, ob)                              # (B*Lq, D)
    out = residual_layernorm(x.reshape(B * Lq, D), attn_out,
                             p["ln_g"], p["ln_b"]).reshape(B, Lq, D)
    return out, kv, prob


def residual_ff(p, x):
    B, L, D = x.shape
    x2 = x.reshape(B * L, D)
    h = linear(x2, p["w1"], p["b1"], activation="relu")
    h = linear(h, p["w2"], p["b2"])
    out = residual_layernorm(x2, h, p["ln_g"], p["ln_b"])
    return out.reshape(B, L, D)


@functools.partial(jax.jit, static_argnames=("n_heads", "head_dim"))
def attention_specific_encoder_block_forward(params, x, mem, mask, src_lang, *,
                                             n_heads, head_dim):
    """Mirrors AttentionSpecificEncoderBlock.forward((x, mem, mask), src_lang)."""
    out, new_mem, att_prob = language_wise_attention(
        params["self_att"], x, mem, mask, src_lang, src_lang, n_heads, head_dim)
    out = residual_ff(params["ff"], out)
    return out, new_mem, att_prob


# ----------------------------------------------------------------------------
# Parameter init (deterministic, synthetic)
# ----------------------------------------------------------------------------
def _init_linear_params(key, d_in, d_out, num_lang=None):
    if num_lang is None:
        w = jax.random.normal(key, (d_in, d_out), jnp.float32) * 0.02
        b = jnp.zeros((d_out,), jnp.float32)
    else:
        w = jax.random.normal(key, (num_lang, d_in, d_out), jnp.float32) * 0.02
        b = jnp.zeros((num_lang, d_out), jnp.float32)
    return w, b


def init_block_params(key, cfg):
    D, P = cfg["hidden_dim"], cfg["projection_dim"]
    H, Dh = cfg["n_heads"], cfg["head_dim"]
    nl = cfg["num_src_lang"]          # convert_kwargs: num_tgt_lang = num_src_lang
    k0, k1, k2, k3, k4, k5 = jax.random.split(key, 6)

    q_w, q_b = _init_linear_params(k0, D, H * Dh, nl)
    k_w, k_b = _init_linear_params(k1, D, H * Dh, nl)
    v_w, v_b = _init_linear_params(k2, D, H * Dh, nl)
    o_w, o_b = _init_linear_params(k3, H * Dh, D, nl)
    self_att = dict(q_w=q_w, q_b=q_b, k_w=k_w, k_b=k_b, v_w=v_w, v_b=v_b,
                    o_w=o_w, o_b=o_b,
                    ln_g=jnp.ones((D,), jnp.float32),
                    ln_b=jnp.zeros((D,), jnp.float32))

    w1, b1 = _init_linear_params(k4, D, P)
    w2, b2 = _init_linear_params(k5, P, D)
    ff = dict(w1=w1, b1=b1, w2=w2, b2=b2,
              ln_g=jnp.ones((D,), jnp.float32),
              ln_b=jnp.zeros((D,), jnp.float32))
    return dict(self_att=self_att, ff=ff)


# ----------------------------------------------------------------------------
if __name__ == "__main__":
    cfg = dict(
        hidden_dim=32, projection_dim=64, n_heads=2, head_dim=16,
        dropout_rate=0.0, dropatt_rate=0.0, num_src_lang=2, seq_len=8,
    )

    key = jax.random.PRNGKey(0)
    kp, kx = jax.random.split(key, 2)
    params = init_block_params(kp, cfg)

    B, L, D = 2, cfg["seq_len"], cfg["hidden_dim"]
    x = jax.random.normal(kx, (B, L, D), jnp.float32)

    # encoder padding mask (1.0 == masked key position), broadcast over queries
    src_len = jnp.array([8, 6], dtype=jnp.int32)
    pad = (jnp.arange(L)[None, :] >= src_len[:, None]).astype(jnp.float32)
    mask = jnp.broadcast_to(pad[:, None, :], (B, L, L))

    src_lang = jnp.int32(0)

    out, new_mem, att_prob = attention_specific_encoder_block_forward(
        params, x, None, mask, src_lang,
        n_heads=cfg["n_heads"], head_dim=cfg["head_dim"])
    jax.block_until_ready(out)

    assert out.shape == (B, L, D)
    assert new_mem.shape == (B, L, D)
    assert att_prob.shape == (B, cfg["n_heads"], L, L)
    assert not bool(jnp.isnan(out).any())
    print("KERNEL_OK")
</pallas_src>

<mosaic_0001>
module attributes {stable_mosaic.version = 11 : i64} {
  func.func @_linear_kernel(%arg0: i32, %arg1: i32, %arg2: i32, %arg3: memref<16x128xbf16, #tpu.memory_space<vmem>>, %arg4: memref<128x128xbf16, #tpu.memory_space<vmem>>, %arg5: memref<1x128xf32, #tpu.memory_space<vmem>>, %arg6: memref<16x128xf32, #tpu.memory_space<vmem>>, %arg7: memref<16x128xf32, #tpu.memory_space<vmem>>) attributes {dimension_semantics = [#tpu.dimension_semantics<parallel>, #tpu.dimension_semantics<parallel>, #tpu.dimension_semantics<arbitrary>], iteration_bounds = array<i64: 1, 1, 1>, scalar_prefetch = 0 : i64, scratch_operands = 1 : i64, tpu.core_type = #tpu.core_type<tc>, window_params = [{transform_indices = @transform_0, window_bounds = array<i64: 16, 128>}, {transform_indices = @transform_1, window_bounds = array<i64: 128, 128>}, {transform_indices = @transform_2, window_bounds = array<i64: 1, 128>}, {transform_indices = @transform_3, window_bounds = array<i64: 16, 128>}]} {
    %c0_i32 = arith.constant 0 : i32
    %0 = arith.cmpi eq, %arg2, %c0_i32 : i32
    %1 = arith.extui %0 : i1 to i32
    %c0_i32_0 = arith.constant 0 : i32
    %2 = arith.cmpi ne, %1, %c0_i32_0 : i32
    scf.if %2 {
      %cst_10 = arith.constant 0.000000e+00 : f32
      %12 = vector.broadcast %cst_10 : f32 to vector<16x128xf32>
      %c0_11 = arith.constant 0 : index
      %c0_12 = arith.constant 0 : index
      %13 = vector.load %arg7[%c0_11, %c0_12] : memref<16x128xf32, #tpu.memory_space<vmem>>, vector<16x128xf32>
      tpu.vector_store %arg7[%c0_11, %c0_12], %12 {strides = array<i32>} : memref<16x128xf32, #tpu.memory_space<vmem>>, vector<16x128xf32>,
    } else {
    }
    %c0 = arith.constant 0 : index
    %c0_1 = arith.constant 0 : index
    %3 = vector.load %arg7[%c0, %c0_1] : memref<16x128xf32, #tpu.memory_space<vmem>>, vector<16x128xf32>
    %c0_2 = arith.constant 0 : index
    %c0_3 = arith.constant 0 : index
    %4 = vector.load %arg3[%c0_2, %c0_3] : memref<16x128xbf16, #tpu.memory_space<vmem>>, vector<16x128xbf16>
    %c0_4 = arith.constant 0 : index
    %c0_5 = arith.constant 0 : index
    %5 = vector.load %arg4[%c0_4, %c0_5] : memref<128x128xbf16, #tpu.memory_space<vmem>>, vector<128x128xbf16>
    %cst = arith.constant dense<0.000000e+00> : vector<16x128xf32>
    %6 = tpu.matmul %4, %5, %cst {dimension_numbers = #tpu.dot_dimension_numbers<[1], [0], [0], [1], [0, 0, 1, 1], [], []>} : vector<16x128xbf16>, vector<128x128xbf16>, vector<16x128xf32> -> vector<16x128xf32>
    %7 = arith.addf %3, %6 : vector<16x128xf32>
    %c0_6 = arith.constant 0 : index
    %c0_7 = arith.constant 0 : index
    %8 = vector.load %arg7[%c0_6, %c0_7] : memref<16x128xf32, #tpu.memory_space<vmem>>, vector<16x128xf32>
    tpu.vector_store %arg7[%c0_6, %c0_7], %7 {strides = array<i32>} : memref<16x128xf32, #tpu.memory_space<vmem>>, vector<16x128xf32>,
    %c0_i32_8 = arith.constant 0 : i32
    %9 = arith.cmpi eq, %arg2, %c0_i32_8 : i32
    %10 = arith.extui %9 : i1 to i32
    %c0_i32_9 = arith.constant 0 : i32
    %11 = arith.cmpi ne, %10, %c0_i32_9 : i32
    scf.if %11 {
      %c0_10 = arith.constant 0 : index
      %c0_11 = arith.constant 0 : index
      %12 = vector.load %arg7[%c0_10, %c0_11] : memref<16x128xf32, #tpu.memory_space<vmem>>, vector<16x128xf32>
      %c0_12 = arith.constant 0 : index
      %c0_13 = arith.constant 0 : index
      %13 = vector.load %arg5[%c0_12, %c0_13] : memref<1x128xf32, #tpu.memory_space<vmem>>, vector<1x128xf32>
      %14 = vector.broadcast %13 : vector<1x128xf32> to vector<16x128xf32>
      %15 = arith.addf %12, %14 : vector<16x128xf32>
      %c0_14 = arith.constant 0 : index
      %c0_15 = arith.constant 0 : index
      %16 = vector.load %arg6[%c0_14, %c0_15] : memref<16x128xf32, #tpu.memory_space<vmem>>, vector<16x128xf32>
      tpu.vector_store %arg6[%c0_14, %c0_15], %15 {strides = array<i32>} : memref<16x128xf32, #tpu.memory_space<vmem>>, vector<16x128xf32>,
    } else {
    }
    return
  }
  func.func @transform_0(%arg0: i32, %arg1: i32, %arg2: i32) -> (i32, i32) {
    %c0_i32 = arith.constant 0 : i32
    return %arg0, %arg2 : i32, i32
  }
  func.func @transform_1(%arg0: i32, %arg1: i32, %arg2: i32) -> (i32, i32) {
    %c0_i32 = arith.constant 0 : i32
    return %arg2, %arg1 : i32, i32
  }
  func.func @transform_2(%arg0: i32, %arg1: i32, %arg2: i32) -> (i32, i32) {
    %c0_i32 = arith.constant 0 : i32
    %c0_i32_0 = arith.constant 0 : i32
    return %c0_i32, %arg1 : i32, i32
  }
  func.func @transform_3(%arg0: i32, %arg1: i32, %arg2: i32) -> (i32, i32) {
    %c0_i32 = arith.constant 0 : i32
    return %arg0, %arg1 : i32, i32
  }
}

module attributes {stable_mosaic.version = 11 : i64} {
  func.func @_attention_kernel(%arg0: i32, %arg1: i32, %arg2: memref<1x2x8x16xbf16, #tpu.memory_space<vmem>>, %arg3: memref<1x2x8x16xbf16, #tpu.memory_space<vmem>>, %arg4: memref<1x2x8x16xbf16, #tpu.memory_space<vmem>>, %arg5: memref<1x8x8xf32, #tpu.memory_space<vmem>>, %arg6: memref<1x2x8x16xf32, #tpu.memory_space<vmem>>, %arg7: memref<1x2x8x8xf32, #tpu.memory_space<vmem>>) attributes {dimension_semantics = [#tpu.dimension_semantics<parallel>, #tpu.dimension_semantics<parallel>], iteration_bounds = array<i64: 2, 1>, scalar_prefetch = 0 : i64, scratch_operands = 0 : i64, tpu.core_type = #tpu.core_type<tc>, window_params = [{transform_indices = @transform_0, window_bounds = array<i64: 1, 2, 8, 16>}, {transform_indices = @transform_1, window_bounds = array<i64: 1, 2, 8, 16>}, {transform_indices = @transform_2, window_bounds = array<i64: 1, 2, 8, 16>}, {transform_indices = @transform_3, window_bounds = array<i64: 1, 8, 8>}, {transform_indices = @transform_4, window_bounds = array<i64: 1, 2, 8, 16>}, {transform_indices = @transform_5, window_bounds = array<i64: 1, 2, 8, 8>}]} {
    %c0 = arith.constant 0 : index
    %c0_0 = arith.constant 0 : index
    %c0_1 = arith.constant 0 : index
    %c0_2 = arith.constant 0 : index
    %0 = vector.load %arg2[%c0, %c0_0, %c0_1, %c0_2] : memref<1x2x8x16xbf16, #tpu.memory_space<vmem>>, vector<1x2x8x16xbf16>
    %1 = vector.shape_cast %0 : vector<1x2x8x16xbf16> to vector<2x8x16xbf16>
    %c0_3 = arith.constant 0 : index
    %c0_4 = arith.constant 0 : index
    %c0_5 = arith.constant 0 : index
    %c0_6 = arith.constant 0 : index
    %2 = vector.load %arg3[%c0_3, %c0_4, %c0_5, %c0_6] : memref<1x2x8x16xbf16, #tpu.memory_space<vmem>>, vector<1x2x8x16xbf16>
    %3 = vector.shape_cast %2 : vector<1x2x8x16xbf16> to vector<2x8x16xbf16>
    %c0_7 = arith.constant 0 : index
    %c0_8 = arith.constant 0 : index
    %c0_9 = arith.constant 0 : index
    %c0_10 = arith.constant 0 : index
    %4 = vector.load %arg4[%c0_7, %c0_8, %c0_9, %c0_10] : memref<1x2x8x16xbf16, #tpu.memory_space<vmem>>, vector<1x2x8x16xbf16>
    %5 = vector.shape_cast %4 : vector<1x2x8x16xbf16> to vector<2x8x16xbf16>
    %c0_11 = arith.constant 0 : index
    %c0_12 = arith.constant 0 : index
    %c0_13 = arith.constant 0 : index
    %6 = vector.load %arg5[%c0_11, %c0_12, %c0_13] : memref<1x8x8xf32, #tpu.memory_space<vmem>>, vector<1x8x8xf32>
    %7 = vector.shape_cast %6 : vector<1x8x8xf32> to vector<8x8xf32>
    "tpu.trace_start"() <{level = 10 : i32, message = "hqd,hkd->hqk"}> : () -> ()
    %cst = arith.constant dense<0.000000e+00> : vector<2x8x8xf32>
    %8 = tpu.matmul %1, %3, %cst {dimension_numbers = #tpu.dot_dimension_numbers<[2], [2], [1], [1], [0, 0, 0, 1, 1, 1], [0], [0]>} : vector<2x8x16xbf16>, vector<2x8x16xbf16>, vector<2x8x8xf32> -> vector<2x8x8xf32>
    "tpu.trace_stop"() : () -> ()
    %cst_14 = arith.constant 2.500000e-01 : f32
    %9 = vector.broadcast %cst_14 : f32 to vector<2x8x8xf32>
    %10 = arith.mulf %8, %9 : vector<2x8x8xf32>
    %11 = vector.shape_cast %7 : vector<8x8xf32> to vector<1x8x8xf32>
    %12 = vector.broadcast %11 : vector<1x8x8xf32> to vector<2x8x8xf32>
    %13 = arith.addf %10, %12 : vector<2x8x8xf32>
    %cst_15 = arith.constant dense<0xFF800000> : vector<2x8xf32>
    %14 = vector.multi_reduction <maximumf>, %13, %cst_15 [2] : vector<2x8x8xf32> to vector<2x8xf32>
    %15 = vector.shape_cast %14 : vector<2x8xf32> to vector<2x8x1xf32>
    %16 = vector.broadcast %15 : vector<2x8x1xf32> to vector<2x8x8xf32>
    %17 = arith.subf %13, %16 : vector<2x8x8xf32>
    %18 = math.exp %17 : vector<2x8x8xf32>
    %cst_16 = arith.constant dense<0.000000e+00> : vector<2x8xf32>
    %19 = vector.multi_reduction <add>, %18, %cst_16 [2] : vector<2x8x8xf32> to vector<2x8xf32>
    %20 = vector.shape_cast %19 : vector<2x8xf32> to vector<2x8x1xf32>
    %21 = tpu.reciprocal %20 {approx = true} : vector<2x8x1xf32> -> vector<2x8x1xf32>
    %22 = vector.broadcast %21 : vector<2x8x1xf32> to vector<2x8x8xf32>
    %23 = arith.mulf %18, %22 : vector<2x8x8xf32>
    %24 = arith.truncf %23 : vector<2x8x8xf32> to vector<2x8x8xbf16>
    "tpu.trace_start"() <{level = 10 : i32, message = "hqk,hkd->hqd"}> : () -> ()
    %cst_17 = arith.constant dense<0.000000e+00> : vector<2x8x16xf32>
    %25 = tpu.matmul %24, %5, %cst_17 {dimension_numbers = #tpu.dot_dimension_numbers<[2], [1], [1], [2], [0, 0, 0, 1, 1, 2], [0], [0]>} : vector<2x8x8xbf16>, vector<2x8x16xbf16>, vector<2x8x16xf32> -> vector<2x8x16xf32>
    "tpu.trace_stop"() : () -> ()
    %c0_18 = arith.constant 0 : index
    %c0_19 = arith.constant 0 : index
    %c0_20 = arith.constant 0 : index
    %c0_21 = arith.constant 0 : index
    %26 = vector.load %arg6[%c0_18, %c0_19, %c0_20, %c0_21] : memref<1x2x8x16xf32, #tpu.memory_space<vmem>>, vector<1x2x8x16xf32>
    %27 = vector.shape_cast %26 : vector<1x2x8x16xf32> to vector<2x8x16xf32>
    %28 = vector.shape_cast %25 : vector<2x8x16xf32> to vector<1x2x8x16xf32>
    tpu.vector_store %arg6[%c0_18, %c0_19, %c0_20, %c0_21], %28 {strides = array<i32>} : memref<1x2x8x16xf32, #tpu.memory_space<vmem>>, vector<1x2x8x16xf32>,
    %c0_22 = arith.constant 0 : index
    %c0_23 = arith.constant 0 : index
    %c0_24 = arith.constant 0 : index
    %c0_25 = arith.constant 0 : index
    %29 = vector.load %arg7[%c0_22, %c0_23, %c0_24, %c0_25] : memref<1x2x8x8xf32, #tpu.memory_space<vmem>>, vector<1x2x8x8xf32>
    %30 = vector.shape_cast %29 : vector<1x2x8x8xf32> to vector<2x8x8xf32>
    %31 = vector.shape_cast %23 : vector<2x8x8xf32> to vector<1x2x8x8xf32>
    tpu.vector_store %arg7[%c0_22, %c0_23, %c0_24, %c0_25], %31 {strides = array<i32>} : memref<1x2x8x8xf32, #tpu.memory_space<vmem>>, vector<1x2x8x8xf32>,
    return
  }
  func.func @transform_0(%arg0: i32, %arg1: i32) -> (i32, i32, i32, i32) {
    %c0_i32 = arith.constant 0 : i32
    %c0_i32_0 = arith.constant 0 : i32
    %c0_i32_1 = arith.constant 0 : i32
    return %arg0, %c0_i32, %arg1, %c0_i32_0 : i32, i32, i32, i32
  }
  func.func @transform_1(%arg0: i32, %arg1: i32) -> (i32, i32, i32, i32) {
    %c0_i32 = arith.constant 0 : i32
    %c0_i32_0 = arith.constant 0 : i32
    %c0_i32_1 = arith.constant 0 : i32
    %c0_i32_2 = arith.constant 0 : i32
    return %arg0, %c0_i32, %c0_i32_0, %c0_i32_1 : i32, i32, i32, i32
  }
  func.func @transform_2(%arg0: i32, %arg1: i32) -> (i32, i32, i32, i32) {
    %c0_i32 = arith.constant 0 : i32
    %c0_i32_0 = arith.constant 0 : i32
    %c0_i32_1 = arith.constant 0 : i32
    %c0_i32_2 = arith.constant 0 : i32
    return %arg0, %c0_i32, %c0_i32_0, %c0_i32_1 : i32, i32, i32, i32
  }
  func.func @transform_3(%arg0: i32, %arg1: i32) -> (i32, i32, i32) {
    %c0_i32 = arith.constant 0 : i32
    %c0_i32_0 = arith.constant 0 : i32
    return %arg0, %arg1, %c0_i32 : i32, i32, i32
  }
  func.func @transform_4(%arg0: i32, %arg1: i32) -> (i32, i32, i32, i32) {
    %c0_i32 = arith.constant 0 : i32
    %c0_i32_0 = arith.constant 0 : i32
    %c0_i32_1 = arith.constant 0 : i32
    return %arg0, %c0_i32, %arg1, %c0_i32_0 : i32, i32, i32, i32
  }
  func.func @transform_5(%arg0: i32, %arg1: i32) -> (i32, i32, i32, i32) {
    %c0_i32 = arith.constant 0 : i32
    %c0_i32_0 = arith.constant 0 : i32
    %c0_i32_1 = arith.constant 0 : i32
    return %arg0, %c0_i32, %arg1, %c0_i32_0 : i32, i32, i32, i32
  }
}

module attributes {stable_mosaic.version = 11 : i64} {
  func.func @_residual_ln_kernel(%arg0: i32, %arg1: memref<16x32xf32, #tpu.memory_space<vmem>>, %arg2: memref<16x32xf32, #tpu.memory_space<vmem>>, %arg3: memref<1x32xf32, #tpu.memory_space<vmem>>, %arg4: memref<1x32xf32, #tpu.memory_space<vmem>>, %arg5: memref<16x32xf32, #tpu.memory_space<vmem>>) attributes {dimension_semantics = [#tpu.dimension_semantics<parallel>], iteration_bounds = array<i64: 1>, scalar_prefetch = 0 : i64, scratch_operands = 0 : i64, tpu.core_type = #tpu.core_type<tc>, window_params = [{transform_indices = @transform_0, window_bounds = array<i64: 16, 32>}, {transform_indices = @transform_1, window_bounds = array<i64: 16, 32>}, {pipeline_mode = #tpu.pipeline_mode<synchronous>, transform_indices = @transform_2, window_bounds = array<i64: 1, 32>}, {pipeline_mode = #tpu.pipeline_mode<synchronous>, transform_indices = @transform_3, window_bounds = array<i64: 1, 32>}, {transform_indices = @transform_4, window_bounds = array<i64: 16, 32>}]} {
    %c0 = arith.constant 0 : index
    %c0_0 = arith.constant 0 : index
    %0 = vector.load %arg1[%c0, %c0_0] : memref<16x32xf32, #tpu.memory_space<vmem>>, vector<16x32xf32>
    %c0_1 = arith.constant 0 : index
    %c0_2 = arith.constant 0 : index
    %1 = vector.load %arg2[%c0_1, %c0_2] : memref<16x32xf32, #tpu.memory_space<vmem>>, vector<16x32xf32>
    %2 = arith.addf %0, %1 : vector<16x32xf32>
    %cst = arith.constant dense<0.000000e+00> : vector<16xf32>
    %3 = vector.multi_reduction <add>, %2, %cst [1] : vector<16x32xf32> to vector<16xf32>
    %4 = vector.shape_cast %3 : vector<16xf32> to vector<16x1xf32>
    %cst_3 = arith.constant 3.200000e+01 : f32
    %5 = vector.broadcast %cst_3 : f32 to vector<16x1xf32>
    %6 = arith.divf %4, %5 : vector<16x1xf32>
    %7 = vector.broadcast %6 : vector<16x1xf32> to vector<16x32xf32>
    %8 = arith.subf %2, %7 : vector<16x32xf32>
    %9 = arith.mulf %8, %8 : vector<16x32xf32>
    %cst_4 = arith.constant dense<0.000000e+00> : vector<16xf32>
    %10 = vector.multi_reduction <add>, %9, %cst_4 [1] : vector<16x32xf32> to vector<16xf32>
    %11 = vector.shape_cast %10 : vector<16xf32> to vector<16x1xf32>
    %cst_5 = arith.constant 3.200000e+01 : f32
    %12 = vector.broadcast %cst_5 : f32 to vector<16x1xf32>
    %13 = arith.divf %11, %12 : vector<16x1xf32>
    %14 = vector.broadcast %6 : vector<16x1xf32> to vector<16x32xf32>
    %15 = arith.subf %2, %14 : vector<16x32xf32>
    %cst_6 = arith.constant 9.99999974E-6 : f32
    %16 = vector.broadcast %cst_6 : f32 to vector<16x1xf32>
    %17 = arith.addf %13, %16 : vector<16x1xf32>
    %18 = math.rsqrt %17 : vector<16x1xf32>
    %19 = vector.broadcast %18 : vector<16x1xf32> to vector<16x32xf32>
    %20 = arith.mulf %15, %19 : vector<16x32xf32>
    %c0_7 = arith.constant 0 : index
    %c0_8 = arith.constant 0 : index
    %21 = vector.load %arg3[%c0_7, %c0_8] : memref<1x32xf32, #tpu.memory_space<vmem>>, vector<1x32xf32>
    %22 = vector.broadcast %21 : vector<1x32xf32> to vector<16x32xf32>
    %23 = arith.mulf %20, %22 : vector<16x32xf32>
    %c0_9 = arith.constant 0 : index
    %c0_10 = arith.constant 0 : index
    %24 = vector.load %arg4[%c0_9, %c0_10] : memref<1x32xf32, #tpu.memory_space<vmem>>, vector<1x32xf32>
    %25 = vector.broadcast %24 : vector<1x32xf32> to vector<16x32xf32>
    %26 = arith.addf %23, %25 : vector<16x32xf32>
    %c0_11 = arith.constant 0 : index
    %c0_12 = arith.constant 0 : index
    %27 = vector.load %arg5[%c0_11, %c0_12] : memref<16x32xf32, #tpu.memory_space<vmem>>, vector<16x32xf32>
    tpu.vector_store %arg5[%c0_11, %c0_12], %26 {strides = array<i32>} : memref<16x32xf32, #tpu.memory_space<vmem>>, vector<16x32xf32>,
    return
  }
  func.func @transform_0(%arg0: i32) -> (i32, i32) {
    %c0_i32 = arith.constant 0 : i32
    %c0_i32_0 = arith.constant 0 : i32
    return %arg0, %c0_i32 : i32, i32
  }
  func.func @transform_1(%arg0: i32) -> (i32, i32) {
    %c0_i32 = arith.constant 0 : i32
    %c0_i32_0 = arith.constant 0 : i32
    return %arg0, %c0_i32 : i32, i32
  }
  func.func @transform_2(%arg0: i32) -> (i32, i32) {
    %c0_i32 = arith.constant 0 : i32
    %c0_i32_0 = arith.constant 0 : i32
    %c0_i32_1 = arith.constant 0 : i32
    return %c0_i32, %c0_i32_0 : i32, i32
  }
  func.func @transform_3(%arg0: i32) -> (i32, i32) {
    %c0_i32 = arith.constant 0 : i32
    %c0_i32_0 = arith.constant 0 : i32
    %c0_i32_1 = arith.constant 0 : i32
    return %c0_i32, %c0_i32_0 : i32, i32
  }
  func.func @transform_4(%arg0: i32) -> (i32, i32) {
    %c0_i32 = arith.constant 0 : i32
    %c0_i32_0 = arith.constant 0 : i32
    return %arg0, %c0_i32 : i32, i32
  }
}

module attributes {stable_mosaic.version = 11 : i64} {
  func.func @_linear_kernel(%arg0: i32, %arg1: i32, %arg2: i32, %arg3: memref<16x128xbf16, #tpu.memory_space<vmem>>, %arg4: memref<128x128xbf16, #tpu.memory_space<vmem>>, %arg5: memref<1x128xf32, #tpu.memory_space<vmem>>, %arg6: memref<16x128xf32, #tpu.memory_space<vmem>>, %arg7: memref<16x128xf32, #tpu.memory_space<vmem>>) attributes {dimension_semantics = [#tpu.dimension_semantics<parallel>, #tpu.dimension_semantics<parallel>, #tpu.dimension_semantics<arbitrary>], iteration_bounds = array<i64: 1, 1, 1>, scalar_prefetch = 0 : i64, scratch_operands = 1 : i64, tpu.core_type = #tpu.core_type<tc>, window_params = [{transform_indices = @transform_0, window_bounds = array<i64: 16, 128>}, {transform_indices = @transform_1, window_bounds = array<i64: 128, 128>}, {transform_indices = @transform_2, window_bounds = array<i64: 1, 128>}, {transform_indices = @transform_3, window_bounds = array<i64: 16, 128>}]} {
    %c0_i32 = arith.constant 0 : i32
    %0 = arith.cmpi eq, %arg2, %c0_i32 : i32
    %1 = arith.extui %0 : i1 to i32
    %c0_i32_0 = arith.constant 0 : i32
    %2 = arith.cmpi ne, %1, %c0_i32_0 : i32
    scf.if %2 {
      %cst_10 = arith.constant 0.000000e+00 : f32
      %12 = vector.broadcast %cst_10 : f32 to vector<16x128xf32>
      %c0_11 = arith.constant 0 : index
      %c0_12 = arith.constant 0 : index
      %13 = vector.load %arg7[%c0_11, %c0_12] : memref<16x128xf32, #tpu.memory_space<vmem>>, vector<16x128xf32>
      tpu.vector_store %arg7[%c0_11, %c0_12], %12 {strides = array<i32>} : memref<16x128xf32, #tpu.memory_space<vmem>>, vector<16x128xf32>,
    } else {
    }
    %c0 = arith.constant 0 : index
    %c0_1 = arith.constant 0 : index
    %3 = vector.load %arg7[%c0, %c0_1] : memref<16x128xf32, #tpu.memory_space<vmem>>, vector<16x128xf32>
    %c0_2 = arith.constant 0 : index
    %c0_3 = arith.constant 0 : index
    %4 = vector.load %arg3[%c0_2, %c0_3] : memref<16x128xbf16, #tpu.memory_space<vmem>>, vector<16x128xbf16>
    %c0_4 = arith.constant 0 : index
    %c0_5 = arith.constant 0 : index
    %5 = vector.load %arg4[%c0_4, %c0_5] : memref<128x128xbf16, #tpu.memory_space<vmem>>, vector<128x128xbf16>
    %cst = arith.constant dense<0.000000e+00> : vector<16x128xf32>
    %6 = tpu.matmul %4, %5, %cst {dimension_numbers = #tpu.dot_dimension_numbers<[1], [0], [0], [1], [0, 0, 1, 1], [], []>} : vector<16x128xbf16>, vector<128x128xbf16>, vector<16x128xf32> -> vector<16x128xf32>
    %7 = arith.addf %3, %6 : vector<16x128xf32>
    %c0_6 = arith.constant 0 : index
    %c0_7 = arith.constant 0 : index
    %8 = vector.load %arg7[%c0_6, %c0_7] : memref<16x128xf32, #tpu.memory_space<vmem>>, vector<16x128xf32>
    tpu.vector_store %arg7[%c0_6, %c0_7], %7 {strides = array<i32>} : memref<16x128xf32, #tpu.memory_space<vmem>>, vector<16x128xf32>,
    %c0_i32_8 = arith.constant 0 : i32
    %9 = arith.cmpi eq, %arg2, %c0_i32_8 : i32
    %10 = arith.extui %9 : i1 to i32
    %c0_i32_9 = arith.constant 0 : i32
    %11 = arith.cmpi ne, %10, %c0_i32_9 : i32
    scf.if %11 {
      %c0_10 = arith.constant 0 : index
      %c0_11 = arith.constant 0 : index
      %12 = vector.load %arg7[%c0_10, %c0_11] : memref<16x128xf32, #tpu.memory_space<vmem>>, vector<16x128xf32>
      %c0_12 = arith.constant 0 : index
      %c0_13 = arith.constant 0 : index
      %13 = vector.load %arg5[%c0_12, %c0_13] : memref<1x128xf32, #tpu.memory_space<vmem>>, vector<1x128xf32>
      %14 = vector.broadcast %13 : vector<1x128xf32> to vector<16x128xf32>
      %15 = arith.addf %12, %14 : vector<16x128xf32>
      %cst_14 = arith.constant 0.000000e+00 : f32
      %16 = vector.broadcast %cst_14 : f32 to vector<16x128xf32>
      %17 = arith.maximumf %15, %16 : vector<16x128xf32>
      %c0_15 = arith.constant 0 : index
      %c0_16 = arith.constant 0 : index
      %18 = vector.load %arg6[%c0_15, %c0_16] : memref<16x128xf32, #tpu.memory_space<vmem>>, vector<16x128xf32>
      tpu.vector_store %arg6[%c0_15, %c0_16], %17 {strides = array<i32>} : memref<16x128xf32, #tpu.memory_space<vmem>>, vector<16x128xf32>,
    } else {
    }
    return
  }
  func.func @transform_0(%arg0: i32, %arg1: i32, %arg2: i32) -> (i32, i32) {
    %c0_i32 = arith.constant 0 : i32
    return %arg0, %arg2 : i32, i32
  }
  func.func @transform_1(%arg0: i32, %arg1: i32, %arg2: i32) -> (i32, i32) {
    %c0_i32 = arith.constant 0 : i32
    return %arg2, %arg1 : i32, i32
  }
  func.func @transform_2(%arg0: i32, %arg1: i32, %arg2: i32) -> (i32, i32) {
    %c0_i32 = arith.constant 0 : i32
    %c0_i32_0 = arith.constant 0 : i32
    return %c0_i32, %arg1 : i32, i32
  }
  func.func @transform_3(%arg0: i32, %arg1: i32, %arg2: i32) -> (i32, i32) {
    %c0_i32 = arith.constant 0 : i32
    return %arg0, %arg1 : i32, i32
  }
}

module attributes {stable_mosaic.version = 11 : i64} {
  func.func @_residual_ln_kernel(%arg0: i32, %arg1: memref<16x32xf32, #tpu.memory_space<vmem>>, %arg2: memref<16x32xf32, #tpu.memory_space<vmem>>, %arg3: memref<1x32xf32, #tpu.memory_space<vmem>>, %arg4: memref<1x32xf32, #tpu.memory_space<vmem>>, %arg5: memref<16x32xf32, #tpu.memory_space<vmem>>) attributes {dimension_semantics = [#tpu.dimension_semantics<parallel>], iteration_bounds = array<i64: 1>, scalar_prefetch = 0 : i64, scratch_operands = 0 : i64, tpu.core_type = #tpu.core_type<tc>, window_params = [{transform_indices = @transform_0, window_bounds = array<i64: 16, 32>}, {transform_indices = @transform_1, window_bounds = array<i64: 16, 32>}, {pipeline_mode = #tpu.pipeline_mode<synchronous>, transform_indices = @transform_2, window_bounds = array<i64: 1, 32>}, {pipeline_mode = #tpu.pipeline_mode<synchronous>, transform_indices = @transform_3, window_bounds = array<i64: 1, 32>}, {transform_indices = @transform_4, window_bounds = array<i64: 16, 32>}]} {
    %c0 = arith.constant 0 : index
    %c0_0 = arith.constant 0 : index
    %0 = vector.load %arg1[%c0, %c0_0] : memref<16x32xf32, #tpu.memory_space<vmem>>, vector<16x32xf32>
    %c0_1 = arith.constant 0 : index
    %c0_2 = arith.constant 0 : index
    %1 = vector.load %arg2[%c0_1, %c0_2] : memref<16x32xf32, #tpu.memory_space<vmem>>, vector<16x32xf32>
    %2 = arith.addf %0, %1 : vector<16x32xf32>
    %cst = arith.constant dense<0.000000e+00> : vector<16xf32>
    %3 = vector.multi_reduction <add>, %2, %cst [1] : vector<16x32xf32> to vector<16xf32>
    %4 = vector.shape_cast %3 : vector<16xf32> to vector<16x1xf32>
    %cst_3 = arith.constant 3.200000e+01 : f32
    %5 = vector.broadcast %cst_3 : f32 to vector<16x1xf32>
    %6 = arith.divf %4, %5 : vector<16x1xf32>
    %7 = vector.broadcast %6 : vector<16x1xf32> to vector<16x32xf32>
    %8 = arith.subf %2, %7 : vector<16x32xf32>
    %9 = arith.mulf %8, %8 : vector<16x32xf32>
    %cst_4 = arith.constant dense<0.000000e+00> : vector<16xf32>
    %10 = vector.multi_reduction <add>, %9, %cst_4 [1] : vector<16x32xf32> to vector<16xf32>
    %11 = vector.shape_cast %10 : vector<16xf32> to vector<16x1xf32>
    %cst_5 = arith.constant 3.200000e+01 : f32
    %12 = vector.broadcast %cst_5 : f32 to vector<16x1xf32>
    %13 = arith.divf %11, %12 : vector<16x1xf32>
    %14 = vector.broadcast %6 : vector<16x1xf32> to vector<16x32xf32>
    %15 = arith.subf %2, %14 : vector<16x32xf32>
    %cst_6 = arith.constant 9.99999974E-6 : f32
    %16 = vector.broadcast %cst_6 : f32 to vector<16x1xf32>
    %17 = arith.addf %13, %16 : vector<16x1xf32>
    %18 = math.rsqrt %17 : vector<16x1xf32>
    %19 = vector.broadcast %18 : vector<16x1xf32> to vector<16x32xf32>
    %20 = arith.mulf %15, %19 : vector<16x32xf32>
    %c0_7 = arith.constant 0 : index
    %c0_8 = arith.constant 0 : index
    %21 = vector.load %arg3[%c0_7, %c0_8] : memref<1x32xf32, #tpu.memory_space<vmem>>, vector<1x32xf32>
    %22 = vector.broadcast %21 : vector<1x32xf32> to vector<16x32xf32>
    %23 = arith.mulf %20, %22 : vector<16x32xf32>
    %c0_9 = arith.constant 0 : index
    %c0_10 = arith.constant 0 : index
    %24 = vector.load %arg4[%c0_9, %c0_10] : memref<1x32xf32, #tpu.memory_space<vmem>>, vector<1x32xf32>
    %25 = vector.broadcast %24 : vector<1x32xf32> to vector<16x32xf32>
    %26 = arith.addf %23, %25 : vector<16x32xf32>
    %c0_11 = arith.constant 0 : index
    %c0_12 = arith.constant 0 : index
    %27 = vector.load %arg5[%c0_11, %c0_12] : memref<16x32xf32, #tpu.memory_space<vmem>>, vector<16x32xf32>
    tpu.vector_store %arg5[%c0_11, %c0_12], %26 {strides = array<i32>} : memref<16x32xf32, #tpu.memory_space<vmem>>, vector<16x32xf32>,
    return
  }
  func.func @transform_0(%arg0: i32) -> (i32, i32) {
    %c0_i32 = arith.constant 0 : i32
    %c0_i32_0 = arith.constant 0 : i32
    return %arg0, %c0_i32 : i32, i32
  }
  func.func @transform_1(%arg0: i32) -> (i32, i32) {
    %c0_i32 = arith.constant 0 : i32
    %c0_i32_0 = arith.constant 0 : i32
    return %arg0, %c0_i32 : i32, i32
  }
  func.func @transform_2(%arg0: i32) -> (i32, i32) {
    %c0_i32 = arith.constant 0 : i32
    %c0_i32_0 = arith.constant 0 : i32
    %c0_i32_1 = arith.constant 0 : i32
    return %c0_i32, %c0_i32_0 : i32, i32
  }
  func.func @transform_3(%arg0: i32) -> (i32, i32) {
    %c0_i32 = arith.constant 0 : i32
    %c0_i32_0 = arith.constant 0 : i32
    %c0_i32_1 = arith.constant 0 : i32
    return %c0_i32, %c0_i32_0 : i32, i32
  }
  func.func @transform_4(%arg0: i32) -> (i32, i32) {
    %c0_i32 = arith.constant 0 : i32
    %c0_i32_0 = arith.constant 0 : i32
    return %arg0, %c0_i32 : i32, i32
  }
}

</mosaic_0001>

<bundles_post_ra>
// kernel: attention_specific_encoder_block_forward.7
= control target key start
LH: loop header
LB: loop body
LE: loop exit
PB: predicated region body
PF: predicated region fallthrough
CT: control target
= control target key end

     0   :  { %s231_s1 = inlined_call_operand.vmem [shape: bf16[128,128], index: 1, kind: input, shape index: {}]   ;;  %s232_s2 = inlined_call_operand.vmem [shape: f32[1,128], index: 2, kind: input, shape index: {}]   ;;  %s233_s0 = inlined_call_operand.vmem [shape: bf16[16,128], index: 0, kind: input, shape index: {}]   ;;  %s234_s3 = inlined_call_operand.vmem [shape: f32[16,128], index: 3, kind: output, shape index: {}]  }
   0x1   :  { %v173_v0 = vld [vmem:[%s231_s1 + $0x38] sm:$0xff]  ;;  %v172_v1 = vld [vmem:[%s231_s1 + $0x30] sm:$0xff]  ;;  %v171_v2 = vld [vmem:[%s231_s1 + $0x28] sm:$0xff] }
   0x2   :  { %94 = vmatpush.bf16.msra.mxu0 %v173_v0  ;;  %v170_v3 = vld [vmem:[%s231_s1 + $0x20] sm:$0xff]  ;;  %v169_v4 = vld [vmem:[%s231_s1 + $0x18] sm:$0xff]  ;;  %v168_v5 = vld [vmem:[%s231_s1 + $0x10] sm:$0xff] }
   0x3   :  { %v167_v6 = vld [vmem:[%s231_s1 + $0x8] sm:$0xff]  ;;  %v166_v7 = vld [vmem:[%s231_s1] sm:$0xff] }
   0x4   :  { %v165_v8 = vld [vmem:[%s233_s0] sm:$0xff] }
   0x5   :  { %v174_v9 = vld [vmem:[%s232_s2] ss:$0 sm:$0xff] }
   0x6   :  { %95 = vmatpush.bf16.msra.mxu0 %v172_v1 }
   0xa   :  { %96 = vmatpush.bf16.msra.mxu0 %v171_v2 }
   0xe   :  { %97 = vmatpush.bf16.msra.mxu0 %v170_v3 }
  0x12   :  { %98 = vmatpush.bf16.msra.mxu0 %v169_v4 }
  0x16   :  { %99 = vmatpush.bf16.msra.mxu0 %v168_v5 }
  0x1a   :  { %100 = vmatpush.bf16.msra.mxu0 %v167_v6 }
  0x1e   :  { %101 = vmatpush.bf16.msra.mxu0 %v166_v7 }
  0x21   :  { %102 = vmatmul.bf16.vlgmr.msra.gmra.mxu0 %v165_v8 }
  0x9e   :  { %v103_v10 = vpop.f32.mrf.mxu0 }
  0x9f   :  { %v121_v11 = vadd.f32 %v174_v9, %v103_v10 }
  0xa1   :  { %123 = vst [vmem:[%s234_s3] sm:$0xff] %v121_v11 }
  0xa6   :  { %v105_v12 = vpop.f32.mrf.mxu0 }
  0xa7   :  { %v122_v13 = vadd.f32 %v174_v9, %v105_v12 }
  0xa9   :  { %124 = vst [vmem:[%s234_s3 + $0x8] sm:$0xff] %v122_v13 }

// kernel: attention_specific_encoder_block_forward.10
= control target key start
LH: loop header
LB: loop body
LE: loop exit
PB: predicated region body
PF: predicated region fallthrough
CT: control target
= control target key end

     0   :  { %vm23_vm0 = vcmask 261120   ;;  %v102_v8 = vmov 32.0   ;;  %s158_s0 = inlined_call_operand.vmem [shape: f32[16,32], index: 0, kind: input, shape index: {}]   ;;  %s159_s1 = inlined_call_operand.vmem [shape: f32[16,32], index: 1, kind: input, shape index: {}]   ;;  %s160_s2 = inlined_call_operand.vmem [shape: f32[1,32], index: 2, kind: input, shape index: {}]   ;;  %s161_s3 = inlined_call_operand.vmem [shape: f32[1,32], index: 3, kind: input, shape index: {}]   ;;  %s162_s4 = inlined_call_operand.vmem [shape: f32[16,32], index: 4, kind: output, shape index: {}]  }
   0x1   :  { %v17_v0 = vld [vmem:[%s158_s0] sm:$0xff]  ;;  %v18_v3 = vld [vmem:[%s158_s0 + $0x8] sm:$0xff]  ;;  %96 = vrcp.f32 %v102_v8 }
   0x2   :  { %v19_v1 = vld [vmem:[%s159_s1] sm:$0xff]  ;;  %v20_v4 = vld [vmem:[%s159_s1 + $0x8] sm:$0xff] }
   0x3   :  { %v21_v2 = vadd.f32 %v19_v1, %v17_v0  ;;  %v22_v6 = vadd.f32 %v20_v4, %v18_v3  ;;  %v94_v39 = vld [vmem:[%s160_s2] ss:$0 sm:$0xff] }
   0x4   :  { %v95_v42 = vld [vmem:[%s161_s3] ss:$0 sm:$0xff] }
   0x5   :  { %v24_v5 = vsel %vm23_vm0, %v21_v2, 0.0  ;;  %v27_v7 = vsel %vm23_vm0, %v22_v6, 0.0 }
   0x6   :  { %25 = vadd.xlane.f32.xlu0 %v24_v5 }
   0x7   :  { %v97_v9 = vpop.eup %96 }
   0x8   :  { %v31_v10 = vmul.f32 32.0, %v97_v9  ;;  %vm35_vm1 = vweird.f32 %v97_v9 }
   0xa   :  { %v32_v11 = vsub.f32 1.0, %v31_v10 }
   0xc   :  { %v33_v12 = vmul.f32 %v97_v9, %v32_v11 }
   0xe   :  { %28 = vadd.xlane.f32.xlu0 %v27_v7  ;;  %v34_v13 = vadd.f32 %v97_v9, %v33_v12 }
  0x10   :  { %v36_v14 = vsel %vm35_vm1, %v97_v9, %v34_v13 }
  0x79   :  { %v26_v15 = vpop.xlane.xlu0 %25 }
  0x7a   :  { %v37_v16 = vmul.f32 %v36_v14, %v26_v15 }
  0x7c   :  { %v39_v17 = vsub.f32 %v21_v2, %v37_v16 }
  0x7e   :  { %v41_v18 = vmul.f32 %v39_v17, %v39_v17 }
  0x80   :  { %v43_v19 = vsel %vm23_vm0, %v41_v18, 0.0 }
  0x81   :  { %44 = vadd.xlane.f32.xlu1 %v43_v19  ;;  %v29_v20 = vpop.xlane.xlu0 %28 }
  0x82   :  { %v38_v21 = vmul.f32 %v36_v14, %v29_v20 }
  0x84   :  { %v40_v22 = vsub.f32 %v22_v6, %v38_v21 }
  0x86   :  { %v42_v23 = vmul.f32 %v40_v22, %v40_v22 }
  0x88   :  { %v46_v24 = vsel %vm23_vm0, %v42_v23, 0.0 }
  0x89   :  { %47 = vadd.xlane.f32.xlu1 %v46_v24 }
  0xf4   :  { %v45_v25 = vpop.xlane.xlu1 %44 }
  0xf5   :  { %v49_v26 = vmul.f32 %v45_v25, %v36_v14 }
  0xf7   :  { %v51_v27 = vadd.f32 1e-05, %v49_v26 }
  0xf9   :  { %98 = vrsqrt.f32 %v51_v27  ;;  %vm59_vm3 = vweird.f32 %v51_v27 }
  0xfc   :  { %v48_v28 = vpop.xlane.xlu1 %47 }
  0xfd   :  { %v50_v29 = vmul.f32 %v48_v28, %v36_v14 }
  0xff   :  { %v99_v30 = vpop.eup %98  ;;  %v52_v31 = vadd.f32 1e-05, %v50_v29 }
 0x100   :  { %v54_v32 = vmul.f32 %v99_v30, %v51_v27  ;;  %vm60_vm2 = vweird.f32 %v99_v30 }
 0x101   :  { %100 = vrsqrt.f32 %v52_v31  ;;  %vm61_vm4 = vmor %vm59_vm3, %vm60_vm2  ;;  %vm69_vm6 = vweird.f32 %v52_v31 }
 0x102   :  { %v55_v33 = vmul.f32 %v99_v30, %v54_v32 }
 0x104   :  { %v56_v34 = vmul.f32 0.5, %v55_v33 }
 0x106   :  { %v57_v35 = vsub.f32 1.5, %v56_v34 }
 0x107   :  { %v101_v36 = vpop.eup %100 }
 0x108   :  { %v58_v37 = vmul.f32 %v99_v30, %v57_v35  ;;  %v64_v38 = vmul.f32 %v101_v36, %v52_v31  ;;  %vm70_vm5 = vweird.f32 %v101_v36 }
 0x109   :  { %vm71_vm7 = vmor %vm69_vm6, %vm70_vm5 }
 0x10a   :  { %v62_v40 = vsel %vm61_vm4, %v99_v30, %v58_v37  ;;  %v65_v41 = vmul.f32 %v101_v36, %v64_v38 }
 0x10b   :  { %v73_v43 = vmul.f32 %v62_v40, %v39_v17 }
 0x10c   :  { %v66_v44 = vmul.f32 0.5, %v65_v41 }
 0x10d   :  { %v79_v45 = vmul.f32 %v94_v39, %v73_v43 }
 0x10e   :  { %v67_v46 = vsub.f32 1.5, %v66_v44 }
 0x10f   :  { %v85_v47 = vadd.f32 %v95_v42, %v79_v45 }
 0x110   :  { %v68_v48 = vmul.f32 %v101_v36, %v67_v46 }
 0x111   :  { %87 = vst.msk [vmem:[%s162_s4] sm:$0xff] %vm23_vm0, %v85_v47 }
 0x112   :  { %v72_v49 = vsel %vm71_vm7, %v101_v36, %v68_v48 }
 0x113   :  { %v74_v50 = vmul.f32 %v72_v49, %v40_v22 }
 0x115   :  { %v80_v51 = vmul.f32 %v94_v39, %v74_v50 }
 0x117   :  { %v86_v52 = vadd.f32 %v95_v42, %v80_v51 }
 0x119   :  { %88 = vst.msk [vmem:[%s162_s4 + $0x8] sm:$0xff] %vm23_vm0, %v86_v52 }

// kernel: attention_specific_encoder_block_forward.8
= control target key start
LH: loop header
LB: loop body
LE: loop exit
PB: predicated region body
PF: predicated region fallthrough
CT: control target
= control target key end

     0   :  { %s976_s0 = inlined_call_operand.vmem [shape: bf16[2,2,8,16], index: 0, kind: input, shape index: {}]   ;;  %s977_s1 = inlined_call_operand.vmem [shape: bf16[2,2,8,16], index: 1, kind: input, shape index: {}]   ;;  %s978_s2 = inlined_call_operand.vmem [shape: bf16[2,2,8,16], index: 2, kind: input, shape index: {}]   ;;  %s979_s3 = inlined_call_operand.vmem [shape: f32[2,8,8], index: 3, kind: input, shape index: {}]   ;;  %s980_s4 = inlined_call_operand.vmem [shape: f32[2,2,8,16], index: 4, kind: output, shape index: {0}]   ;;  %s981_s5 = inlined_call_operand.hbm [shape: f32[2,2,8,8], index: 5, kind: output, shape index: {1}]  }
   0x1   :  { %982 = sst [smem:[#allocation5_spill]] %s976_s0 }
   0x2   :  { %11 = vsyncpa [#allocation3], 0 }
   0x3   :  { %13 = vsyncpa [#allocation3 + $0x1], 0  ;;  %s843_s18 = smov 0   ;;  %s845_s19 = smov 0  }
   0x4   :  { %s847_s20 = smov 0   ;;  %s849_s21 = smov 0  }
   0x5   :  { %s851_s22 = smov 0   ;;  %s853_s23 = smov 0  }
   0x6 LB: > { %s637_s24 = sadd.s32 4294967295, %s809_s23   ;;  %s638_s25 = sadd.s32 4294967294, %s809_s23   ;;  %s809_s23 = sphi %s853_s23, %s19_s23   ;;  %s805_s22 = sphi %s851_s22, %s990_s22   ;;  %s801_s21 = sphi %s849_s21, %s989_s21   ;;  %s797_s20 = sphi %s847_s20, %s988_s20   ;;  %s793_s19 = sphi %s845_s19, %s987_s19   ;;  %s789_s18 = sphi %s843_s18, %s986_s18  }
   0x7   : > { %s31_s26 = sadd.s32 1, %s805_s22  ;;  %s176_s27 = sadd.s32 1, %s797_s20 }
   0x8   : > { %p33_p0 = scmp.ge.s32.totalorder %s31_s26, 2  ;;  %p186_p1 = scmp.ne.s32.totalorder %s797_s20, %s793_s19 }
   0x9   : > { %p187_p2 = scmp.eq.s32.totalorder %s637_s24, 1  ;;  %p192_p3 = scmp.ne.s32.totalorder %s793_s19, %s789_s18 }
   0xa   : > { %s992_s26 = smov (%p33_p0, %s31_s26), 0  ;;  %p193_p5 = scmp.eq.s32.totalorder %s638_s25, 1 }
   0xb   : > { %p883_p4 = por %p187_p2, %p186_p1  ;;  %s171_s29 = ssub.s32 %s805_s22, %s992_s26 }
   0xc   : > { %p641_p6 = scmp.ge.s32.totalorder %s809_s23, 1  ;;  %p174_p7 = scmp.eq.s32.totalorder %s171_s29, 0 }
   0xd   : > { %p890_p8 = por %p193_p5, %p192_p3  ;;  %p248_p9 = scmp.lt.s32.totalorder %s809_s23, 3 }
   0xe   : > { %s896_s6 = scalar_select %p174_p7, %s797_s20, %s176_s27  }
   0xf   : > { %p249_p10 = pnand %p641_p6, %p248_p9 }
  0x10   : > { %p304_p11 = scmp.lt.s32.totalorder (!%p249_p10), %s801_s21, 1  ;;  %s985_s0 = sld [smem:[#allocation5_spill]] (!%p249_p10) }
  0x11   : > { %252 = sbr.rel (%p249_p10) target bundleno = 569 (0x239), region = 36  ;;  %s301_s29 = sand.u32 (!%p249_p10), 1, %s793_s19  }
  0x12   : > { %s642_s9 = sshll.u32 (!%p249_p10), %s301_s29, 4  ;;  %s465_s16 = scalar_lea.sflag (!%p249_p10), [#allocation3], %s301_s29 }
  0x13   : > { %s303_s10 = scalar_lea.vmem (!%p249_p10), [#allocation2], %s642_s9 }
  0x16   : > { %s900_s7 = scalar_select %p304_p11, %s801_s21, 1  ;;  %vm345_vm0 = vcmask 130048   ;;  %vm388_vm1 = vcmask 64512   ;;  %vm416_vm2 = vcmask 1043456  }
  0x18   : > { %s903_s8 = sshll.u32 %s900_s7, 3 }
  0x19   : > { %s316_s11 = scalar_lea.vmem %s977_s1, %s903_s8  ;;  %s311_s14 = scalar_lea.vmem %s985_s0, %s903_s8 }
  0x1a   : > { %v340_v0 = vld [vmem:[%s316_s11] sm:$0xf]  ;;  %v341_v1 = vld [vmem:[%s316_s11 + $0x4] sm:$0xf]  ;;  %s328_s17 = scalar_lea.vmem %s979_s3, %s903_s8  ;;  %s321_s27 = scalar_lea.vmem %s978_s2, %s903_s8 }
  0x1b   : > { %v350_v2 = vsel %vm345_vm0, %v340_v0, 0  ;;  %v369_v3 = vsel %vm345_vm0, %v341_v1, 0  ;;  %v338_v4 = vld [vmem:[%s311_s14] sm:$0xf]  ;;  %v339_v5 = vld [vmem:[%s311_s14 + $0x4] sm:$0xf] }
  0x1c   : > { %359 = vmatpush.bf16.xpose.msra.mxu0 %v350_v2  ;;  %378 = vmatpush.bf16.xpose.msra.mxu1 %v369_v3  ;;  %v344_v8 = vld [vmem:[%s328_s17] sm:$0xff]  ;;  %s665_s8 = sshll.u32 %s801_s21, 4  ;;  %s481_s14 = sshll.u32 %s303_s10, 4  ;;  %s482_s14 = int_to_ptr.vmem [resolvable:$true] %s481_s14 }
  0x1d   : > { %v342_v27 = vld [vmem:[%s321_s27] sm:$0xf]  ;;  %v343_v29 = vld [vmem:[%s321_s27 + $0x4] sm:$0xf]  ;;  %s480_s13 = scalar_lea.hbm %s981_s5, %s665_s8  ;;  %s751_s21 = scalar_lea.hbm %s981_s5, 32 }
  0x1e   : > { %v418_v28 = vsel %vm416_vm2, %v342_v27, 0  ;;  %v437_v30 = vsel %vm416_vm2, %v343_v29, 0  ;;  %s483_s15 = sshll.u32 %s480_s13, 4  ;;  %s484_s15 = int_to_ptr.hbm [resolvable:$true] %s483_s15 }
  0x1f   : > { %427 = vmatpush.bf16.msra.mxu2 %v418_v28  ;;  %446 = vmatpush.bf16.msra.mxu3 %v437_v30  ;;  %s745_s17 = sshra.s32 %s484_s15, 4  ;;  %s746_s17 = int_to_ptr.hbm [resolvable:$true] %s745_s17 }
  0x20   : > { %s747_s24 = scalar_lea.hbm %s746_s17, 16  ;;  %p752_p1 = scmp.lt.s32.totalorder %s746_s17, %s981_s5 }
  0x21   : > { %p748_p12 = scmp.ne.s32.totalorder %s746_s17, %s747_s24  ;;  %p753_p2 = scmp.lt.s32.totalorder %s751_s21, %s747_s24 }
  0x23   : > { %652 = vmatmul.msk.bf16.vlgmr.msra.gmra.mxu0 %vm345_vm0, %v338_v4  ;;  %653 = vmatmul.msk.bf16.vlgmr.msra.gmra.mxu1 %vm345_vm0, %v339_v5  ;;  %p749_p13 = pnand %p748_p12, %p883_p4  ;;  %p754_p3 = por %p753_p2, %p752_p1 }
  0x25   : > { %p750_p0 = pneg %p749_p13 }
  0x27   : > { %p755_p5 = pnand %p754_p3, %p750_p0 }
  0xa0   : > { %v361_v6 = vpop.f32.mrf.mxu0  ;;  %v380_v7 = vpop.f32.mrf.mxu1 }
  0xa1   : > { %v384_v9 = vmul.f32 0.25, %v361_v6  ;;  %v385_v10 = vmul.f32 0.25, %v380_v7 }
  0xa3   : > { %v386_v11 = vadd.f32 %v384_v9, %v344_v8  ;;  %v387_v13 = vadd.f32 %v385_v10, %v344_v8 }
  0xa5   : > { %v389_v12 = vsel %vm388_vm1, %v386_v11, -inf  ;;  %v392_v16 = vsel %vm388_vm1, %v387_v13, -inf }
  0xa6   : > { %390 = vmax.xlane.f32.xlu0 %v389_v12 }
  0xa8   : > { %v363_v14 = vpop.f32.mrf.mxu0  ;;  %v382_v15 = vpop.f32.mrf.mxu1 }
  0xae   : > { %393 = vmax.xlane.f32.xlu0 %v392_v16 }
 0x119   : > { %v391_v17 = vpop.xlane.xlu0 %390 }
 0x11a   : > { %v395_v18 = vsub.f32 %v386_v11, %v391_v17 }
 0x11c   : > { %v397_v19 = vmul.f32 1.442695, %v395_v18 }
 0x11e   : > { %723 = vpow2.f32 %v397_v19 }
 0x121   : > { %v394_v20 = vpop.xlane.xlu0 %393 }
 0x122   : > { %v396_v21 = vsub.f32 %v387_v13, %v394_v20 }
 0x124   : > { %v724_v22 = vpop.eup %723  ;;  %v399_v23 = vmul.f32 1.442695, %v396_v21 }
 0x125   : > { %v401_v24 = vsel %vm388_vm1, %v724_v22, 0.0 }
 0x126   : > { %725 = vpow2.f32 %v399_v23  ;;  %402 = vadd.xlane.f32.xlu1 %v401_v24 }
 0x12c   : > { %v726_v25 = vpop.eup %725 }
 0x12d   : > { %v404_v26 = vsel %vm388_vm1, %v726_v25, 0.0 }
 0x12e   : > { %405 = vadd.xlane.f32.xlu1 %v404_v26 }
 0x199   : > { %v403_v31 = vpop.xlane.xlu1 %402 }
 0x19a   : > { %727 = vrcp.f32 %v403_v31 }
 0x1a0   : > { %v728_v32 = vpop.eup %727 }
 0x1a1   : > { %v406_v33 = vpop.xlane.xlu1 %405  ;;  %v409_v34 = vmul.f32 %v728_v32, %v724_v22 }
 0x1a2   : > { %729 = vrcp.f32 %v406_v33 }
 0x1a3   : > { %v411_v35 = vpack.c.bf16 %v409_v34, %v409_v34  ;;  %454 = vst.msk [vmem:[%s303_s10] sm:$0xff] %vm388_vm1, %v409_v34 }
 0x1a5   : > { %654 = vmatmul.msk.bf16.vlgmr.msra.gmra.mxu2 %vm388_vm1, %v411_v35 }
 0x1a8   : > { %v730_v36 = vpop.eup %729 }
 0x1a9   : > { %v410_v37 = vmul.f32 %v730_v36, %v726_v25 }
 0x1ab   : > { %v412_v38 = vpack.c.bf16 %v410_v37, %v410_v37  ;;  %455 = vst.msk [vmem:[%s303_s10 + $0x8] sm:$0xff] %vm388_vm1, %v410_v37 }
 0x1ad   : > { %655 = vmatmul.msk.bf16.vlgmr.msra.gmra.mxu3 %vm388_vm1, %v412_v38 }
 0x1ae   : > { %758 = shalt.err (!%p755_p5)
}
 0x1af   : > { %s811_s29 = smov 128   ;;  %s812_s10 = smov 8  }
 0x1b0   : > { %666 = dma.vmem_to_hbm [thread:$0]  (%p883_p4), %s482_s14, 256, %s484_s15, %s465_s16, %s811_s29, %s811_s29, %s812_s10  }
 0x1b1   : > { %s664_s8 = sshll.u32 %s900_s7, 4 }
 0x1b2   : > { %s336_s13 = scalar_lea.vmem %s980_s4, %s664_s8 }
 0x228   : > { %v429_v39 = vpop.f32.mrf.mxu2 }
 0x229   : > { %452 = vst.msk [vmem:[%s336_s13] sm:$0xff] %vm345_vm0, %v429_v39 }
 0x230   : > { %v431_v40 = vpop.f32.mrf.mxu2  ;;  %v448_v41 = vpop.f32.mrf.mxu3 }
 0x231   : > { %453 = vst.msk [vmem:[%s336_s13 + $0x8] sm:$0xff] %vm345_vm0, %v448_v41 }
 0x238   : > { %v450_v42 = vpop.f32.mrf.mxu3 }
 0x239 PF: > { %p672_p6 = scmp.ge.s32.totalorder %s809_s23, 2  ;;  %s509_s0 = sand.u32 1, %s789_s18  }
 0x23a   : > { %s510_s28 = scalar_lea.sflag [#allocation3], %s509_s0 }
 0x23b   : > { %p669_p4 = pnand %p672_p6, %p890_p8 }
 0x23d   : > { %p670_p7 = pneg %p669_p4 }
 0x23f   : > { %784 = dma.done.wait (%p670_p7), %s510_s28, 256  }
 0x240   : > { %786 = vsyncadd (%p670_p7), %s510_s28, 4294967040  ;;  %s19_s23 = sadd.s32 1, %s809_s23   ;;  %s986_s18 = smov %s793_s19 }
 0x241   : > { %p16_p9 = scmp.ge.s32.totalorder %s19_s23, 4   ;;  %s987_s19 = smov %s797_s20 }
 0x242   : > { %s988_s20 = smov %s896_s6  ;;  %s989_s21 = smov %s805_s22 }
 0x243   : > { %s990_s22 = smov %s992_s26  ;;  %18 = sbr.rel (!%p16_p9) target bundleno = 6 (0x6), region = 92 }
 0x248   :  { %516 = vsyncpa [#allocation3], 1 }
 0x249   :  { %518 = vsyncpa [#allocation3 + $0x1], 1 }

// kernel: attention_specific_encoder_block_forward.11
= control target key start
LH: loop header
LB: loop body
LE: loop exit
PB: predicated region body
PF: predicated region fallthrough
CT: control target
= control target key end

     0   :  { %s233_s1 = inlined_call_operand.vmem [shape: bf16[128,128], index: 1, kind: input, shape index: {}]   ;;  %s234_s2 = inlined_call_operand.vmem [shape: f32[1,128], index: 2, kind: input, shape index: {}]   ;;  %s235_s0 = inlined_call_operand.vmem [shape: bf16[16,128], index: 0, kind: input, shape index: {}]   ;;  %s236_s3 = inlined_call_operand.vmem [shape: f32[16,128], index: 3, kind: output, shape index: {}]  }
   0x1   :  { %v175_v0 = vld [vmem:[%s233_s1 + $0x38] sm:$0xff]  ;;  %v174_v1 = vld [vmem:[%s233_s1 + $0x30] sm:$0xff]  ;;  %v173_v2 = vld [vmem:[%s233_s1 + $0x28] sm:$0xff] }
   0x2   :  { %94 = vmatpush.bf16.msra.mxu0 %v175_v0  ;;  %v172_v3 = vld [vmem:[%s233_s1 + $0x20] sm:$0xff]  ;;  %v171_v4 = vld [vmem:[%s233_s1 + $0x18] sm:$0xff]  ;;  %v170_v5 = vld [vmem:[%s233_s1 + $0x10] sm:$0xff] }
   0x3   :  { %v169_v6 = vld [vmem:[%s233_s1 + $0x8] sm:$0xff]  ;;  %v168_v7 = vld [vmem:[%s233_s1] sm:$0xff] }
   0x4   :  { %v167_v8 = vld [vmem:[%s235_s0] sm:$0xff] }
   0x5   :  { %v176_v9 = vld [vmem:[%s234_s2] ss:$0 sm:$0xff] }
   0x6   :  { %95 = vmatpush.bf16.msra.mxu0 %v174_v1 }
   0xa   :  { %96 = vmatpush.bf16.msra.mxu0 %v173_v2 }
   0xe   :  { %97 = vmatpush.bf16.msra.mxu0 %v172_v3 }
  0x12   :  { %98 = vmatpush.bf16.msra.mxu0 %v171_v4 }
  0x16   :  { %99 = vmatpush.bf16.msra.mxu0 %v170_v5 }
  0x1a   :  { %100 = vmatpush.bf16.msra.mxu0 %v169_v6 }
  0x1e   :  { %101 = vmatpush.bf16.msra.mxu0 %v168_v7 }
  0x21   :  { %102 = vmatmul.bf16.vlgmr.msra.gmra.mxu0 %v167_v8 }
  0x9e   :  { %v103_v10 = vpop.f32.mrf.mxu0 }
  0x9f   :  { %v121_v11 = vadd.f32 %v176_v9, %v103_v10 }
  0xa1   :  { %v123_v12 = vmax.f32 %v121_v11, 0.0 }
  0xa3   :  { %125 = vst [vmem:[%s236_s3] sm:$0xff] %v123_v12 }
  0xa6   :  { %v105_v13 = vpop.f32.mrf.mxu0 }
  0xa7   :  { %v122_v14 = vadd.f32 %v176_v9, %v105_v13 }
  0xa9   :  { %v124_v15 = vmax.f32 %v122_v14, 0.0 }
  0xab   :  { %126 = vst [vmem:[%s236_s3 + $0x8] sm:$0xff] %v124_v15 }

// kernel: attention_specific_encoder_block_forward.13
= control target key start
LH: loop header
LB: loop body
LE: loop exit
PB: predicated region body
PF: predicated region fallthrough
CT: control target
= control target key end

     0   :  { %vm24_vm0 = vcmask 261120   ;;  %s202_s0 = inlined_call_operand.vmem [shape: f32[16,32], index: 0, kind: input, shape index: {}]   ;;  %s203_s1 = inlined_call_operand.vmem [shape: f32[16,32], index: 1, kind: input, shape index: {}]   ;;  %s204_s2 = inlined_call_operand.vmem [shape: f32[1,32], index: 2, kind: input, shape index: {}]   ;;  %s205_s3 = inlined_call_operand.vmem [shape: f32[1,32], index: 3, kind: input, shape index: {}]   ;;  %s206_s4 = inlined_call_operand.hbm [shape: f32[16,32], index: 4, kind: output, shape index: {}]  }
   0x1   :  { %v18_v0 = vld [vmem:[%s202_s0] sm:$0xff] }
   0x2   :  { %v20_v1 = vld [vmem:[%s203_s1] sm:$0xff] }
   0x3   :  { %v22_v2 = vadd.f32 %v20_v1, %v18_v0 }
   0x4   :  { %9 = vsyncpa [#allocation3], 0  ;;  %v19_v3 = vld [vmem:[%s202_s0 + $0x8] sm:$0xff]  ;;  %v146_v8 = vmov 32.0   ;;  %v112_v39 = vld [vmem:[%s204_s2] ss:$0 sm:$0xff] }
   0x5   :  { %v21_v4 = vld [vmem:[%s203_s1 + $0x8] sm:$0xff]  ;;  %v25_v5 = vsel %vm24_vm0, %v22_v2, 0.0  ;;  %114 = vrcp.f32 %v146_v8  ;;  %v113_v43 = vld [vmem:[%s205_s3] ss:$0 sm:$0xff]  ;;  %s147_s2 = smov [#allocation2]   ;;  %s96_s28 = sshll.u32 %s206_s4, 4  ;;  %s97_s28 = int_to_ptr.hbm [resolvable:$true] %s96_s28 }
   0x6   :  { %26 = vadd.xlane.f32.xlu0 %v25_v5  ;;  %v23_v6 = vadd.f32 %v21_v4, %v19_v3  ;;  %s94_s25 = sshll.u32 %s147_s2, 4  ;;  %s148_s3 = smov 128   ;;  %s95_s25 = int_to_ptr.vmem [resolvable:$true] %s94_s25 }
   0x7   :  { %s149_s29 = smov 8  }
   0x8   :  { %v28_v7 = vsel %vm24_vm0, %v23_v6, 0.0 }
   0xb   :  { %v115_v9 = vpop.eup %114 }
   0xc   :  { %v32_v10 = vmul.f32 32.0, %v115_v9  ;;  %vm36_vm1 = vweird.f32 %v115_v9 }
   0xe   :  { %29 = vadd.xlane.f32.xlu0 %v28_v7  ;;  %v33_v11 = vsub.f32 1.0, %v32_v10 }
  0x10   :  { %v34_v12 = vmul.f32 %v115_v9, %v33_v11 }
  0x12   :  { %v35_v13 = vadd.f32 %v115_v9, %v34_v12 }
  0x14   :  { %v37_v14 = vsel %vm36_vm1, %v115_v9, %v35_v13 }
  0x79   :  { %v27_v15 = vpop.xlane.xlu0 %26 }
  0x7a   :  { %v38_v16 = vmul.f32 %v37_v14, %v27_v15 }
  0x7c   :  { %v40_v17 = vsub.f32 %v22_v2, %v38_v16 }
  0x7e   :  { %v42_v18 = vmul.f32 %v40_v17, %v40_v17 }
  0x80   :  { %v44_v19 = vsel %vm24_vm0, %v42_v18, 0.0 }
  0x81   :  { %45 = vadd.xlane.f32.xlu1 %v44_v19  ;;  %v30_v20 = vpop.xlane.xlu0 %29 }
  0x82   :  { %v39_v21 = vmul.f32 %v37_v14, %v30_v20 }
  0x84   :  { %v41_v22 = vsub.f32 %v23_v6, %v39_v21 }
  0x86   :  { %v43_v23 = vmul.f32 %v41_v22, %v41_v22 }
  0x88   :  { %v47_v24 = vsel %vm24_vm0, %v43_v23, 0.0 }
  0x89   :  { %48 = vadd.xlane.f32.xlu1 %v47_v24 }
  0xf4   :  { %v46_v25 = vpop.xlane.xlu1 %45 }
  0xf5   :  { %v50_v26 = vmul.f32 %v46_v25, %v37_v14 }
  0xf7   :  { %v52_v27 = vadd.f32 1e-05, %v50_v26 }
  0xf9   :  { %116 = vrsqrt.f32 %v52_v27  ;;  %vm60_vm3 = vweird.f32 %v52_v27 }
  0xfc   :  { %v49_v28 = vpop.xlane.xlu1 %48 }
  0xfd   :  { %v51_v29 = vmul.f32 %v49_v28, %v37_v14 }
  0xff   :  { %v117_v30 = vpop.eup %116  ;;  %v53_v31 = vadd.f32 1e-05, %v51_v29 }
 0x100   :  { %v55_v32 = vmul.f32 %v117_v30, %v52_v27  ;;  %vm61_vm2 = vweird.f32 %v117_v30 }
 0x101   :  { %118 = vrsqrt.f32 %v53_v31  ;;  %vm62_vm4 = vmor %vm60_vm3, %vm61_vm2  ;;  %vm70_vm6 = vweird.f32 %v53_v31 }
 0x102   :  { %v56_v33 = vmul.f32 %v117_v30, %v55_v32 }
 0x104   :  { %v57_v34 = vmul.f32 0.5, %v56_v33 }
 0x106   :  { %v58_v35 = vsub.f32 1.5, %v57_v34 }
 0x107   :  { %v119_v36 = vpop.eup %118 }
 0x108   :  { %v59_v37 = vmul.f32 %v117_v30, %v58_v35  ;;  %v65_v38 = vmul.f32 %v119_v36, %v53_v31  ;;  %vm71_vm5 = vweird.f32 %v119_v36 }
 0x109   :  { %vm72_vm7 = vmor %vm70_vm6, %vm71_vm5 }
 0x10a   :  { %v63_v40 = vsel %vm62_vm4, %v117_v30, %v59_v37  ;;  %v66_v41 = vmul.f32 %v119_v36, %v65_v38 }
 0x10b   :  { %v74_v42 = vmul.f32 %v63_v40, %v40_v17 }
 0x10c   :  { %v67_v44 = vmul.f32 0.5, %v66_v41 }
 0x10d   :  { %v80_v45 = vmul.f32 %v112_v39, %v74_v42 }
 0x10e   :  { %v68_v46 = vsub.f32 1.5, %v67_v44 }
 0x10f   :  { %v86_v47 = vadd.f32 %v113_v43, %v80_v45 }
 0x110   :  { %v69_v48 = vmul.f32 %v119_v36, %v68_v46 }
 0x111   :  { %88 = vst.msk [vmem:[#allocation2] sm:$0xff] %vm24_vm0, %v86_v47 }
 0x112   :  { %v73_v49 = vsel %vm72_vm7, %v119_v36, %v69_v48 }
 0x113   :  { %v75_v50 = vmul.f32 %v73_v49, %v41_v22 }
 0x115   :  { %v81_v51 = vmul.f32 %v112_v39, %v75_v50 }
 0x117   :  { %v87_v52 = vadd.f32 %v113_v43, %v81_v51 }
 0x119   :  { %89 = vst.msk [vmem:[#allocation2 + $0x8] sm:$0xff] %vm24_vm0, %v87_v52 }
 0x11a   :  { %102 = dma.vmem_to_hbm [thread:$0]  %s95_s25, 256, %s97_s28, [#allocation3], %s148_s3, %s148_s3, %s149_s29  }
 0x11b   :  { %144 = dma.done.wait [#allocation3], 256  }
 0x11c   :  { %145 = vsyncadd [#allocation3], 4294967040 }
 0x11d   :  { %107 = vsyncpa [#allocation3], 1 }

</bundles_post_ra>
